<compile_context>
chip_gen: v7x
topology: tpu7x:2x2x1
jax: 0.10.0
libtpu: 0.0.40
codegen_flags: <defaults>
</compile_context>

<pallas_src>
import jax
import jax.numpy as jnp
from jax.experimental import pallas as pl
from jax.experimental.pallas import tpu as pltpu

LANES = 128               # vreg lane width: last dim of the lane-dense slab
DEFAULT_TILE_ROWS = 2048  # rows x 128 f32 ~= 1 MiB per block; ~4 MiB VMEM total


def logreg_kernel(w_ref, b_ref, x_ref, o_ref):
    # w_ref / b_ref: (1,) scalars in SMEM.  x_ref / o_ref: (tile, 128) VMEM.
    w = w_ref[0]
    b = b_ref[0]
    o_ref[...] = jax.nn.sigmoid(x_ref[...] * w + b).astype(o_ref.dtype)


def logistic_regression(x, w, b, *, tile_rows=DEFAULT_TILE_ROWS):
    """y = sigmoid(x @ W^T + b) for Linear(1, 1). x: (N, 1) float."""
    # Elementwise form is only valid for 1->1 linear; guard it.
    assert w.shape == (1, 1), f"expected Linear(1,1) weight (1,1), got {w.shape}"
    n, f = x.shape
    assert f == 1, f"expected feature dim 1, got {f}"

    # ---- lane-dense repack: (N, 1) -> (rows, 128) ----
    x_flat = x.reshape(-1)                         # contiguous -> copy-free
    padded_n = pl.cdiv(n, LANES) * LANES
    aligned = padded_n == n
    if not aligned:
        # Single pad pass only up to the next lane multiple (<=127 extra elems).
        x_flat = jnp.pad(x_flat, (0, padded_n - n))
    rows = padded_n // LANES
    x2d = x_flat.reshape(rows, LANES)              # copy-free

    # ---- tile selection ----
    # Tiny inputs: one full-array block (exempt from the (8,128) rule).
    # Otherwise: multiple-of-8 row tiles, >=2 grid steps (v7x megacore), and a
    # ragged final block that Pallas masks -- no re-padding of rows.
    if rows <= 8:
        tile = rows
    else:
        tile = min(tile_rows, 8 * pl.cdiv(pl.cdiv(rows, 2), 8))
    grid = (pl.cdiv(rows, tile),)

    w_s = w.reshape(1).astype(jnp.float32)
    b_s = jnp.asarray(b).reshape(1).astype(jnp.float32)

    out2d = pl.pallas_call(
        logreg_kernel,
        out_shape=jax.ShapeDtypeStruct((rows, LANES), x.dtype),
        grid=grid,
        in_specs=[
            # scalar params: SMEM, whole-array (no VMEM tiles, no per-step DMA)
            pl.BlockSpec(memory_space=pltpu.MemorySpace.SMEM),
            pl.BlockSpec(memory_space=pltpu.MemorySpace.SMEM),
            # data: lane-dense row tiles, pipelined over the grid
            pl.BlockSpec((tile, LANES), lambda i: (i, 0)),
        ],
        out_specs=pl.BlockSpec((tile, LANES), lambda i: (i, 0)),
        compiler_params=pltpu.CompilerParams(
            dimension_semantics=("parallel",),
        ),
    )(w_s, b_s, x2d)

    if aligned:
        # Copy-free reshape back to the (N, 1) module layout.
        return out2d.reshape(n, 1)
    # Ragged tail: strip the <=127 padded elements (one slice copy of N elems).
    return out2d.reshape(-1)[:n].reshape(n, 1)


if __name__ == "__main__":
    key = jax.random.PRNGKey(0)
    kx, kw, kb, kx2, kx3 = jax.random.split(key, 5)

    # Deterministic params mimicking nn.Linear(1, 1): W (1,1), b (1,)
    w = jax.random.normal(kw, (1, 1), dtype=jnp.float32)
    b = jax.random.normal(kb, (1,), dtype=jnp.float32)

    def ref(xv):
        return jax.nn.sigmoid(xv @ w.T + b.reshape(1, 1))

    # Small batch consistent with Linear(1, 1): 8 scalar samples.
    x = jax.random.normal(kx, (8, 1), dtype=jnp.float32)
    y = logistic_regression(x, w, b)
    jax.block_until_ready(y)
    assert y.shape == (8, 1)
    assert jnp.allclose(y, ref(x), atol=1e-6), "mismatch vs reference (small)"

    # Lane-aligned batch: exercises the copy-free fast path (no pad, no slice).
    x_mid = jax.random.normal(kx3, (4096, 1), dtype=jnp.float32)
    y_mid = logistic_regression(x_mid, w, b)
    jax.block_until_ready(y_mid)
    assert y_mid.shape == (4096, 1)
    assert jnp.allclose(y_mid, ref(x_mid), atol=1e-6), "mismatch vs reference (mid)"

    # Larger ragged batch: lane-tail padding + multi-step ragged grid + slicing.
    x_big = jax.random.normal(kx2, (70_000, 1), dtype=jnp.float32)
    y_big = logistic_regression(x_big, w, b)
    jax.block_until_ready(y_big)
    assert y_big.shape == (70_000, 1)
    assert jnp.allclose(y_big, ref(x_big), atol=1e-6), "mismatch vs reference (big)"

    print("KERNEL_OK")
</pallas_src>

<mosaic_0001>
module attributes {stable_mosaic.version = 11 : i64} {
  func.func @logreg_kernel(%arg0: i32, %arg1: memref<1xf32, #tpu.memory_space<smem>>, %arg2: memref<1xf32, #tpu.memory_space<smem>>, %arg3: memref<1x128xf32, #tpu.memory_space<vmem>>, %arg4: memref<1x128xf32, #tpu.memory_space<vmem>>) attributes {dimension_semantics = [#tpu.dimension_semantics<parallel>], iteration_bounds = array<i64: 1>, scalar_prefetch = 0 : i64, scratch_operands = 0 : i64, tpu.core_type = #tpu.core_type<tc>, window_params = [{transform_indices = @transform_0, window_bounds = array<i64: 1>}, {transform_indices = @transform_1, window_bounds = array<i64: 1>}, {transform_indices = @transform_2, window_bounds = array<i64: 1, 128>}, {transform_indices = @transform_3, window_bounds = array<i64: 1, 128>}]} {
    %c0 = arith.constant 0 : index
    %0 = memref.load %arg1[%c0] : memref<1xf32, #tpu.memory_space<smem>>
    %c0_0 = arith.constant 0 : index
    %1 = memref.load %arg2[%c0_0] : memref<1xf32, #tpu.memory_space<smem>>
    %c0_1 = arith.constant 0 : index
    %c0_2 = arith.constant 0 : index
    %2 = vector.load %arg3[%c0_1, %c0_2] : memref<1x128xf32, #tpu.memory_space<vmem>>, vector<1x128xf32>
    %3 = vector.broadcast %0 : f32 to vector<1x128xf32>
    %4 = arith.mulf %2, %3 : vector<1x128xf32>
    %5 = vector.broadcast %1 : f32 to vector<1x128xf32>
    %6 = arith.addf %4, %5 : vector<1x128xf32>
    %7 = arith.negf %6 : vector<1x128xf32>
    %8 = math.exp %7 : vector<1x128xf32>
    %cst = arith.constant 1.000000e+00 : f32
    %9 = vector.broadcast %cst : f32 to vector<1x128xf32>
    %10 = arith.addf %9, %8 : vector<1x128xf32>
    %11 = arith.divf %9, %10 : vector<1x128xf32>
    %c0_3 = arith.constant 0 : index
    %c0_4 = arith.constant 0 : index
    %12 = vector.load %arg4[%c0_3, %c0_4] : memref<1x128xf32, #tpu.memory_space<vmem>>, vector<1x128xf32>
    tpu.vector_store %arg4[%c0_3, %c0_4], %11 {strides = array<i32>} : memref<1x128xf32, #tpu.memory_space<vmem>>, vector<1x128xf32>,
    return
  }
  func.func @transform_0(%arg0: i32) -> i32 {
    %c0_i32 = arith.constant 0 : i32
    %c0_i32_0 = arith.constant 0 : i32
    return %c0_i32 : i32
  }
  func.func @transform_1(%arg0: i32) -> i32 {
    %c0_i32 = arith.constant 0 : i32
    %c0_i32_0 = arith.constant 0 : i32
    return %c0_i32 : i32
  }
  func.func @transform_2(%arg0: i32) -> (i32, i32) {
    %c0_i32 = arith.constant 0 : i32
    %c0_i32_0 = arith.constant 0 : i32
    return %arg0, %c0_i32 : i32, i32
  }
  func.func @transform_3(%arg0: i32) -> (i32, i32) {
    %c0_i32 = arith.constant 0 : i32
    %c0_i32_0 = arith.constant 0 : i32
    return %arg0, %c0_i32 : i32, i32
  }
}

</mosaic_0001>

<bundles_post_ra>
// kernel: tpu_custom_call.1
= control target key start
LH: loop header
LB: loop body
LE: loop exit
PB: predicated region body
PF: predicated region fallthrough
CT: control target
= control target key end

     0   :  { %s117_s0 = inlined_call_operand.<no memory space> [shape: f32[1], index: 0, kind: input, shape index: {}]   ;;  %s118_s1 = inlined_call_operand.<no memory space> [shape: f32[1], index: 1, kind: input, shape index: {}]   ;;  %s119_s2 = inlined_call_operand.vmem [shape: f32[1,128], index: 2, kind: input, shape index: {}]   ;;  %s120_s3 = inlined_call_operand.hbm [shape: f32[1,128], index: 3, kind: output, shape index: {}]  }
   0x1   :  { %v19_v0 = vld [vmem:[%s119_s2] sm:$0x1]  ;;  %v20_v1 = vstv %s117_s0  ;;  %v22_v2 = vstv %s118_s1 }
   0x2   :  { %10 = vsyncpa [#allocation5], 0  ;;  %v21_v3 = vmul.f32 %v20_v1, %v19_v0  ;;  %s75_s18 = smov [#allocation4]  }
   0x3   :  { %s37_s19 = sshll.u32 %s75_s18, 4  ;;  %s38_s19 = int_to_ptr.vmem [resolvable:$true] %s37_s19 }
   0x4   :  { %v23_v4 = vadd.f32 %v22_v2, %v21_v3  ;;  %s51_s2 = scalar_lea.vmem %s38_s19, 16  ;;  %s55_s0 = scalar_lea.vmem %s38_s19, 32 }
   0x5   :  { %p52_p0 = scmp.ne.s32.totalorder %s38_s19, %s51_s2  ;;  %p56_p1 = scmp.lt.s32.totalorder %s38_s19, %s38_s19 }
   0x6   :  { %v45_v5 = vmul.f32 -1.442695, %v23_v4  ;;  %p57_p2 = scmp.lt.s32.totalorder %s55_s0, %s51_s2 }
   0x8   :  { %47 = vpow2.f32 %v45_v5  ;;  %p58_p3 = por %p57_p2, %p56_p1 }
   0xa   :  { %p59_p4 = pnand %p58_p3, %p52_p0 }
  0x12   :  { %v48_v6 = vpop.eup %47 }
  0x13   :  { %v27_v7 = vadd.f32 1.0, %v48_v6 }
  0x15   :  { %49 = vrcp.f32 %v27_v7 }
  0x1f   :  { %v50_v8 = vpop.eup %49 }
  0x20   :  { %30 = vst [vmem:[#allocation4] sm:$0x1] %v50_v8 }
  0x21   :  { %62 = shalt.err (!%p59_p4)
}
  0x22   :  { %s63_s21 = scalar_lea.hbm %s120_s3, 16 }
  0x23   :  { %p64_p5 = scmp.ne.s32.totalorder %s120_s3, %s63_s21  ;;  %p67_p6 = scmp.lt.u32.totalorder %s63_s21, %s120_s3 }
  0x25   :  { %p69_p7 = pnand %p67_p6, %p64_p5 }
  0x27   :  { %72 = shalt.err (!%p69_p7)
}
  0x28   :  { %40 = dma.vmem_to_hbm [thread:$0]  %s38_s19, 16, %s120_s3, [#allocation5]  }
  0x29   :  { %73 = dma.done.wait [#allocation5], 16  }
  0x2a   :  { %74 = vsyncadd [#allocation5], 4294967280 }
  0x2b   :  { %44 = vsyncpa [#allocation5], 1 }

</bundles_post_ra>
